<compile_context>
chip_gen: v7x
topology: tpu7x:2x2x1
jax: 0.10.0
libtpu: 0.0.40
codegen_flags: <defaults>
</compile_context>

<pallas_src>
import jax
import jax.numpy as jnp
from jax import lax
from jax.experimental import pallas as pl
from jax.experimental.pallas import tpu as pltpu

LANE = 128
SUBLANE = 8
VMEM_LIMIT_BYTES = 48 * 1024 * 1024   # <= v7x 64 MiB/TC; above v5e/v6e scoped defaults
VMEM_TILE_BUDGET = 40 * 1024 * 1024   # headroom under the limit for compiler scratch


def _round_up(x, m):
    return ((x + m - 1) // m) * m


def _hardswish(x):
    # PyTorch nn.Hardswish: x * relu6(x + 3) / 6
    return x * jnp.clip(x + 3.0, 0.0, 6.0) * (1.0 / 6.0)


# --------------------------------------------------------------------------- #
# Kernel
# --------------------------------------------------------------------------- #
def actor_ppo_kernel(x_ref,
                     w1_ref, b1_ref,
                     w2_ref, b2_ref,
                     w3_ref, b3_ref,
                     w4_ref, b4_ref,
                     out_ref):
    """x_ref: (TB, state_dim); w*: (out, in); b*: (out, 1) f32; out_ref: (act_pad, TB)."""
    cdt = w1_ref.dtype                       # matmul operand dtype (bf16 or f32)
    nt = (((1,), (1,)), ((), ()))            # contract last dims: (o,i) x (TB,i) -> (o,TB)

    x = x_ref[...].astype(cdt)               # (TB, state_dim), transpose absorbed by MXU

    h = lax.dot_general(w1_ref[...], x, nt,
                        preferred_element_type=jnp.float32) + b1_ref[...]
    h = jnp.maximum(h, 0.0)                                   # ReLU  (f32 VPU)

    h = jnp.dot(w2_ref[...], h.astype(cdt),
                preferred_element_type=jnp.float32) + b2_ref[...]
    h = jnp.maximum(h, 0.0)                                   # ReLU

    h = jnp.dot(w3_ref[...], h.astype(cdt),
                preferred_element_type=jnp.float32) + b3_ref[...]
    h = _hardswish(h)                                         # Hardswish (f32)

    h = jnp.dot(w4_ref[...], h.astype(cdt),
                preferred_element_type=jnp.float32) + b4_ref[...]
    out_ref[...] = jnp.tanh(h).astype(out_ref.dtype)          # tanh


# --------------------------------------------------------------------------- #
# Wrapper
# --------------------------------------------------------------------------- #
def _resident_spec(shape, single_buffer):
    """VMEM-resident array: full-shape block, constant index map."""
    ndim = len(shape)
    index_map = lambda i, _n=ndim: (0,) * _n
    if single_buffer:
        # Block index never changes -> one buffer is enough; halves weight VMEM.
        return pl.BlockSpec(shape, index_map, pipeline_mode=pl.Buffered(1))
    return pl.BlockSpec(shape, index_map)


def actor_ppo_forward(state, params, *, batch_tile=2048,
                      compute_dtype=jnp.bfloat16, out_dtype=None):
    """state: (B, state_dim); params in PyTorch layout (w: (out, in), b: (out,)).

    Returns tanh(net(state)) with shape (B, action_dim).
    """
    B, state_dim = state.shape
    mid_dim = params["w1"].shape[0]
    action_dim = params["w4"].shape[0]
    out_dtype = state.dtype if out_dtype is None else out_dtype

    if B == 0:                                    # empty rollout slice
        return jnp.zeros((0, action_dim), out_dtype)

    act_pad = _round_up(action_dim, SUBLANE)
    cbytes = jnp.dtype(compute_dtype).itemsize
    obytes = jnp.dtype(out_dtype).itemsize

    # ---- batch tile selection ------------------------------------------------
    b_pad_min = _round_up(B, LANE)
    tb = min(_round_up(batch_tile, LANE), b_pad_min)
    # Keep >= 2 grid steps when the batch is big enough, so the "parallel"
    # axis actually feeds both v7x TensorCores.
    if b_pad_min >= 2 * LANE:
        tb = min(tb, _round_up(pl.cdiv(b_pad_min, 2), LANE))

    def _step_vmem_bytes(t):
        x_blk = t * state_dim * cbytes * 2                       # double-buffered in
        o_blk = act_pad * t * obytes * 2                         # double-buffered out
        w = (mid_dim * state_dim + 2 * mid_dim * mid_dim
             + act_pad * mid_dim) * cbytes * 2                   # worst case: 2 bufs
        bias = (3 * mid_dim + act_pad) * 4 * 2
        inter = 3 * mid_dim * t * 4                              # live f32 intermediates
        return x_blk + o_blk + w + bias + inter

    while tb > LANE and _step_vmem_bytes(tb) > VMEM_TILE_BUDGET:
        tb = max(LANE, _round_up(tb // 2, LANE))

    b_pad = _round_up(B, tb)
    grid = (b_pad // tb,)

    # ---- inputs ----------------------------------------------------------------
    if b_pad == B:
        # No padding copy needed: stream at native dtype, cast per-tile in-kernel
        # (cheaper than an extra HBM cast round trip).
        x_in = state
    else:
        # A padding copy is unavoidable; fuse the compute-dtype cast into it so
        # the streamed state bytes are halved when compute_dtype is bf16.
        x_in = jnp.pad(state, ((0, b_pad - B), (0, 0))).astype(compute_dtype)

    w1 = params["w1"].astype(compute_dtype)
    w2 = params["w2"].astype(compute_dtype)
    w3 = params["w3"].astype(compute_dtype)
    w4 = jnp.pad(params["w4"],
                 ((0, act_pad - action_dim), (0, 0))).astype(compute_dtype)

    b1 = params["b1"].reshape(mid_dim, 1).astype(jnp.float32)
    b2 = params["b2"].reshape(mid_dim, 1).astype(jnp.float32)
    b3 = params["b3"].reshape(mid_dim, 1).astype(jnp.float32)
    b4 = jnp.pad(params["b4"],
                 (0, act_pad - action_dim)).reshape(act_pad, 1).astype(jnp.float32)

    weight_args = (w1, b1, w2, b2, w3, b3, w4, b4)

    x_spec = pl.BlockSpec((tb, state_dim), lambda i: (i, 0))        # streamed
    out_spec = pl.BlockSpec((act_pad, tb), lambda i: (0, i))        # streamed, lane-dense

    def run(single_buffer_weights):
        in_specs = [x_spec] + [_resident_spec(a.shape, single_buffer_weights)
                               for a in weight_args]
        return pl.pallas_call(
            actor_ppo_kernel,
            out_shape=jax.ShapeDtypeStruct((act_pad, b_pad), out_dtype),
            grid=grid,
            in_specs=in_specs,
            out_specs=out_spec,
            compiler_params=pltpu.CompilerParams(
                dimension_semantics=("parallel",),
                vmem_limit_bytes=VMEM_LIMIT_BYTES,
            ),
        )(x_in, *weight_args)

    try:
        out_t = run(single_buffer_weights=True)
    except Exception:
        # Fallback for JAX versions without BlockSpec(pipeline_mode=...);
        # weights simply keep the default double buffer.
        out_t = run(single_buffer_weights=False)

    # strip padding, back to (B, action_dim)
    return out_t[:action_dim, :B].T


# --------------------------------------------------------------------------- #
# Parameter init (PyTorch nn.Linear layout + U(-1/sqrt(fan_in), +) init)
# --------------------------------------------------------------------------- #
def init_params(key, state_dim, mid_dim, action_dim):
    dims = [(state_dim, mid_dim), (mid_dim, mid_dim),
            (mid_dim, mid_dim), (mid_dim, action_dim)]
    params = {}
    keys = jax.random.split(key, 2 * len(dims))
    for i, (fan_in, fan_out) in enumerate(dims):
        bound = 1.0 / float(fan_in) ** 0.5
        params[f"w{i + 1}"] = jax.random.uniform(
            keys[2 * i], (fan_out, fan_in), jnp.float32, -bound, bound)
        params[f"b{i + 1}"] = jax.random.uniform(
            keys[2 * i + 1], (fan_out,), jnp.float32, -bound, bound)
    # a_logstd exists on the module but is unused by forward(); kept for parity.
    params["a_logstd"] = jnp.zeros((1, action_dim), jnp.float32) - 0.5
    return params


def reference_forward(state, p, compute_dtype=jnp.float32):
    """Pure-JAX reference applying the same operand-dtype casts as the kernel."""
    cdt = compute_dtype
    h = jnp.dot(state.astype(cdt), p["w1"].astype(cdt).T,
                preferred_element_type=jnp.float32) + p["b1"]
    h = jnp.maximum(h, 0.0)
    h = jnp.dot(h.astype(cdt), p["w2"].astype(cdt).T,
                preferred_element_type=jnp.float32) + p["b2"]
    h = jnp.maximum(h, 0.0)
    h = jnp.dot(h.astype(cdt), p["w3"].astype(cdt).T,
                preferred_element_type=jnp.float32) + p["b3"]
    h = _hardswish(h)
    h = jnp.dot(h.astype(cdt), p["w4"].astype(cdt).T,
                preferred_element_type=jnp.float32) + p["b4"]
    return jnp.tanh(h)


if __name__ == "__main__":
    B, state_dim, mid_dim, action_dim = 2, 16, 32, 4

    key = jax.random.PRNGKey(0)
    k_x, k_p = jax.random.split(key)
    state = jax.random.normal(k_x, (B, state_dim), jnp.float32)
    params = init_params(k_p, state_dim, mid_dim, action_dim)

    # Exact-layout check with f32 matmul operands.
    out_f32 = jax.block_until_ready(
        actor_ppo_forward(state, params, compute_dtype=jnp.float32))
    ref_f32 = reference_forward(state, params, jnp.float32)
    assert out_f32.shape == (B, action_dim), out_f32.shape
    # Tolerance covers possible MXU f32 pass-count differences (Mosaic vs XLA).
    assert jnp.allclose(out_f32, ref_f32, atol=5e-2, rtol=5e-2), "f32 mismatch vs reference"

    # Default fast path: bf16 matmul operands, f32 accumulation.
    out_bf16 = jax.block_until_ready(actor_ppo_forward(state, params))
    ref_bf16 = reference_forward(state, params, jnp.bfloat16)
    assert out_bf16.shape == (B, action_dim), out_bf16.shape
    assert jnp.allclose(out_bf16, ref_bf16, atol=5e-2, rtol=5e-2), "bf16 mismatch vs reference"

    print("KERNEL_OK")
</pallas_src>

<mosaic_0001>
module attributes {stable_mosaic.version = 11 : i64} {
  func.func @actor_ppo_kernel(%arg0: i32, %arg1: memref<128x16xf32, #tpu.memory_space<vmem>>, %arg2: memref<32x16xf32, #tpu.memory_space<vmem>>, %arg3: memref<32x1xf32, #tpu.memory_space<vmem>>, %arg4: memref<32x32xf32, #tpu.memory_space<vmem>>, %arg5: memref<32x1xf32, #tpu.memory_space<vmem>>, %arg6: memref<32x32xf32, #tpu.memory_space<vmem>>, %arg7: memref<32x1xf32, #tpu.memory_space<vmem>>, %arg8: memref<8x32xf32, #tpu.memory_space<vmem>>, %arg9: memref<8x1xf32, #tpu.memory_space<vmem>>, %arg10: memref<8x128xf32, #tpu.memory_space<vmem>>) attributes {dimension_semantics = [#tpu.dimension_semantics<parallel>], iteration_bounds = array<i64: 1>, scalar_prefetch = 0 : i64, scratch_operands = 0 : i64, tpu.core_type = #tpu.core_type<tc>, window_params = [{transform_indices = @transform_0, window_bounds = array<i64: 128, 16>}, {pipeline_mode = #tpu.pipeline_mode<synchronous>, transform_indices = @transform_1, window_bounds = array<i64: 32, 16>}, {pipeline_mode = #tpu.pipeline_mode<synchronous>, transform_indices = @transform_2, window_bounds = array<i64: 32, 1>}, {pipeline_mode = #tpu.pipeline_mode<synchronous>, transform_indices = @transform_3, window_bounds = array<i64: 32, 32>}, {pipeline_mode = #tpu.pipeline_mode<synchronous>, transform_indices = @transform_4, window_bounds = array<i64: 32, 1>}, {pipeline_mode = #tpu.pipeline_mode<synchronous>, transform_indices = @transform_5, window_bounds = array<i64: 32, 32>}, {pipeline_mode = #tpu.pipeline_mode<synchronous>, transform_indices = @transform_6, window_bounds = array<i64: 32, 1>}, {pipeline_mode = #tpu.pipeline_mode<synchronous>, transform_indices = @transform_7, window_bounds = array<i64: 8, 32>}, {pipeline_mode = #tpu.pipeline_mode<synchronous>, transform_indices = @transform_8, window_bounds = array<i64: 8, 1>}, {transform_indices = @transform_9, window_bounds = array<i64: 8, 128>}]} {
    %c0 = arith.constant 0 : index
    %c0_0 = arith.constant 0 : index
    %0 = vector.load %arg1[%c0, %c0_0] : memref<128x16xf32, #tpu.memory_space<vmem>>, vector<128x16xf32>
    %c0_1 = arith.constant 0 : index
    %c0_2 = arith.constant 0 : index
    %1 = vector.load %arg2[%c0_1, %c0_2] : memref<32x16xf32, #tpu.memory_space<vmem>>, vector<32x16xf32>
    %cst = arith.constant dense<0.000000e+00> : vector<32x128xf32>
    %2 = tpu.matmul %1, %0, %cst {dimension_numbers = #tpu.dot_dimension_numbers<[1], [1], [0], [0], [0, 0, 1, 0], [], []>} : vector<32x16xf32>, vector<128x16xf32>, vector<32x128xf32> -> vector<32x128xf32>
    %c0_3 = arith.constant 0 : index
    %c0_4 = arith.constant 0 : index
    %3 = vector.load %arg3[%c0_3, %c0_4] : memref<32x1xf32, #tpu.memory_space<vmem>>, vector<32x1xf32>
    %4 = vector.broadcast %3 : vector<32x1xf32> to vector<32x128xf32>
    %5 = arith.addf %2, %4 : vector<32x128xf32>
    %cst_5 = arith.constant 0.000000e+00 : f32
    %6 = vector.broadcast %cst_5 : f32 to vector<32x128xf32>
    %7 = arith.maximumf %5, %6 : vector<32x128xf32>
    %c0_6 = arith.constant 0 : index
    %c0_7 = arith.constant 0 : index
    %8 = vector.load %arg4[%c0_6, %c0_7] : memref<32x32xf32, #tpu.memory_space<vmem>>, vector<32x32xf32>
    %cst_8 = arith.constant dense<0.000000e+00> : vector<32x128xf32>
    %9 = tpu.matmul %8, %7, %cst_8 {dimension_numbers = #tpu.dot_dimension_numbers<[1], [0], [0], [1], [0, 0, 1, 1], [], []>} : vector<32x32xf32>, vector<32x128xf32>, vector<32x128xf32> -> vector<32x128xf32>
    %c0_9 = arith.constant 0 : index
    %c0_10 = arith.constant 0 : index
    %10 = vector.load %arg5[%c0_9, %c0_10] : memref<32x1xf32, #tpu.memory_space<vmem>>, vector<32x1xf32>
    %11 = vector.broadcast %10 : vector<32x1xf32> to vector<32x128xf32>
    %12 = arith.addf %9, %11 : vector<32x128xf32>
    %cst_11 = arith.constant 0.000000e+00 : f32
    %13 = vector.broadcast %cst_11 : f32 to vector<32x128xf32>
    %14 = arith.maximumf %12, %13 : vector<32x128xf32>
    %c0_12 = arith.constant 0 : index
    %c0_13 = arith.constant 0 : index
    %15 = vector.load %arg6[%c0_12, %c0_13] : memref<32x32xf32, #tpu.memory_space<vmem>>, vector<32x32xf32>
    %cst_14 = arith.constant dense<0.000000e+00> : vector<32x128xf32>
    %16 = tpu.matmul %15, %14, %cst_14 {dimension_numbers = #tpu.dot_dimension_numbers<[1], [0], [0], [1], [0, 0, 1, 1], [], []>} : vector<32x32xf32>, vector<32x128xf32>, vector<32x128xf32> -> vector<32x128xf32>
    %c0_15 = arith.constant 0 : index
    %c0_16 = arith.constant 0 : index
    %17 = vector.load %arg7[%c0_15, %c0_16] : memref<32x1xf32, #tpu.memory_space<vmem>>, vector<32x1xf32>
    %18 = vector.broadcast %17 : vector<32x1xf32> to vector<32x128xf32>
    %19 = arith.addf %16, %18 : vector<32x128xf32>
    %cst_17 = arith.constant 3.000000e+00 : f32
    %20 = vector.broadcast %cst_17 : f32 to vector<32x128xf32>
    %21 = arith.addf %19, %20 : vector<32x128xf32>
    %cst_18 = arith.constant 0.000000e+00 : f32
    %cst_19 = arith.constant 6.000000e+00 : f32
    %22 = vector.broadcast %cst_18 : f32 to vector<32x128xf32>
    %23 = arith.maximumf %22, %21 : vector<32x128xf32>
    %24 = vector.broadcast %cst_19 : f32 to vector<32x128xf32>
    %25 = arith.minimumf %24, %23 : vector<32x128xf32>
    %26 = arith.mulf %19, %25 : vector<32x128xf32>
    %cst_20 = arith.constant 0.166666672 : f32
    %27 = vector.broadcast %cst_20 : f32 to vector<32x128xf32>
    %28 = arith.mulf %26, %27 : vector<32x128xf32>
    %c0_21 = arith.constant 0 : index
    %c0_22 = arith.constant 0 : index
    %29 = vector.load %arg8[%c0_21, %c0_22] : memref<8x32xf32, #tpu.memory_space<vmem>>, vector<8x32xf32>
    %cst_23 = arith.constant dense<0.000000e+00> : vector<8x128xf32>
    %30 = tpu.matmul %29, %28, %cst_23 {dimension_numbers = #tpu.dot_dimension_numbers<[1], [0], [0], [1], [0, 0, 1, 1], [], []>} : vector<8x32xf32>, vector<32x128xf32>, vector<8x128xf32> -> vector<8x128xf32>
    %c0_24 = arith.constant 0 : index
    %c0_25 = arith.constant 0 : index
    %31 = vector.load %arg9[%c0_24, %c0_25] : memref<8x1xf32, #tpu.memory_space<vmem>>, vector<8x1xf32>
    %32 = vector.broadcast %31 : vector<8x1xf32> to vector<8x128xf32>
    %33 = arith.addf %30, %32 : vector<8x128xf32>
    %34 = math.tanh %33 : vector<8x128xf32>
    %c0_26 = arith.constant 0 : index
    %c0_27 = arith.constant 0 : index
    %35 = vector.load %arg10[%c0_26, %c0_27] : memref<8x128xf32, #tpu.memory_space<vmem>>, vector<8x128xf32>
    tpu.vector_store %arg10[%c0_26, %c0_27], %34 {strides = array<i32>} : memref<8x128xf32, #tpu.memory_space<vmem>>, vector<8x128xf32>,
    return
  }
  func.func @transform_0(%arg0: i32) -> (i32, i32) {
    %c0_i32 = arith.constant 0 : i32
    %c0_i32_0 = arith.constant 0 : i32
    return %arg0, %c0_i32 : i32, i32
  }
  func.func @transform_1(%arg0: i32) -> (i32, i32) {
    %c0_i32 = arith.constant 0 : i32
    %c0_i32_0 = arith.constant 0 : i32
    %c0_i32_1 = arith.constant 0 : i32
    return %c0_i32, %c0_i32_0 : i32, i32
  }
  func.func @transform_2(%arg0: i32) -> (i32, i32) {
    %c0_i32 = arith.constant 0 : i32
    %c0_i32_0 = arith.constant 0 : i32
    %c0_i32_1 = arith.constant 0 : i32
    return %c0_i32, %c0_i32_0 : i32, i32
  }
  func.func @transform_3(%arg0: i32) -> (i32, i32) {
    %c0_i32 = arith.constant 0 : i32
    %c0_i32_0 = arith.constant 0 : i32
    %c0_i32_1 = arith.constant 0 : i32
    return %c0_i32, %c0_i32_0 : i32, i32
  }
  func.func @transform_4(%arg0: i32) -> (i32, i32) {
    %c0_i32 = arith.constant 0 : i32
    %c0_i32_0 = arith.constant 0 : i32
    %c0_i32_1 = arith.constant 0 : i32
    return %c0_i32, %c0_i32_0 : i32, i32
  }
  func.func @transform_5(%arg0: i32) -> (i32, i32) {
    %c0_i32 = arith.constant 0 : i32
    %c0_i32_0 = arith.constant 0 : i32
    %c0_i32_1 = arith.constant 0 : i32
    return %c0_i32, %c0_i32_0 : i32, i32
  }
  func.func @transform_6(%arg0: i32) -> (i32, i32) {
    %c0_i32 = arith.constant 0 : i32
    %c0_i32_0 = arith.constant 0 : i32
    %c0_i32_1 = arith.constant 0 : i32
    return %c0_i32, %c0_i32_0 : i32, i32
  }
  func.func @transform_7(%arg0: i32) -> (i32, i32) {
    %c0_i32 = arith.constant 0 : i32
    %c0_i32_0 = arith.constant 0 : i32
    %c0_i32_1 = arith.constant 0 : i32
    return %c0_i32, %c0_i32_0 : i32, i32
  }
  func.func @transform_8(%arg0: i32) -> (i32, i32) {
    %c0_i32 = arith.constant 0 : i32
    %c0_i32_0 = arith.constant 0 : i32
    %c0_i32_1 = arith.constant 0 : i32
    return %c0_i32, %c0_i32_0 : i32, i32
  }
  func.func @transform_9(%arg0: i32) -> (i32, i32) {
    %c0_i32 = arith.constant 0 : i32
    %c0_i32_0 = arith.constant 0 : i32
    return %c0_i32, %arg0 : i32, i32
  }
}

module attributes {stable_mosaic.version = 11 : i64} {
  func.func @actor_ppo_kernel(%arg0: i32, %arg1: memref<128x16xf32, #tpu.memory_space<vmem>>, %arg2: memref<32x16xf32, #tpu.memory_space<vmem>>, %arg3: memref<32x1xf32, #tpu.memory_space<vmem>>, %arg4: memref<32x32xf32, #tpu.memory_space<vmem>>, %arg5: memref<32x1xf32, #tpu.memory_space<vmem>>, %arg6: memref<32x32xf32, #tpu.memory_space<vmem>>, %arg7: memref<32x1xf32, #tpu.memory_space<vmem>>, %arg8: memref<8x32xf32, #tpu.memory_space<vmem>>, %arg9: memref<8x1xf32, #tpu.memory_space<vmem>>, %arg10: memref<8x128xf32, #tpu.memory_space<vmem>>) attributes {dimension_semantics = [#tpu.dimension_semantics<parallel>], iteration_bounds = array<i64: 1>, scalar_prefetch = 0 : i64, scratch_operands = 0 : i64, tpu.core_type = #tpu.core_type<tc>, window_params = [{transform_indices = @transform_0, window_bounds = array<i64: 128, 16>}, {pipeline_mode = #tpu.pipeline_mode<synchronous>, transform_indices = @transform_1, window_bounds = array<i64: 32, 16>}, {pipeline_mode = #tpu.pipeline_mode<synchronous>, transform_indices = @transform_2, window_bounds = array<i64: 32, 1>}, {pipeline_mode = #tpu.pipeline_mode<synchronous>, transform_indices = @transform_3, window_bounds = array<i64: 32, 32>}, {pipeline_mode = #tpu.pipeline_mode<synchronous>, transform_indices = @transform_4, window_bounds = array<i64: 32, 1>}, {pipeline_mode = #tpu.pipeline_mode<synchronous>, transform_indices = @transform_5, window_bounds = array<i64: 32, 32>}, {pipeline_mode = #tpu.pipeline_mode<synchronous>, transform_indices = @transform_6, window_bounds = array<i64: 32, 1>}, {pipeline_mode = #tpu.pipeline_mode<synchronous>, transform_indices = @transform_7, window_bounds = array<i64: 8, 32>}, {pipeline_mode = #tpu.pipeline_mode<synchronous>, transform_indices = @transform_8, window_bounds = array<i64: 8, 1>}, {transform_indices = @transform_9, window_bounds = array<i64: 8, 128>}]} {
    %c0 = arith.constant 0 : index
    %c0_0 = arith.constant 0 : index
    %0 = vector.load %arg1[%c0, %c0_0] : memref<128x16xf32, #tpu.memory_space<vmem>>, vector<128x16xf32>
    %c0_1 = arith.constant 0 : index
    %c0_2 = arith.constant 0 : index
    %1 = vector.load %arg2[%c0_1, %c0_2] : memref<32x16xf32, #tpu.memory_space<vmem>>, vector<32x16xf32>
    %cst = arith.constant dense<0.000000e+00> : vector<32x128xf32>
    %2 = tpu.matmul %1, %0, %cst {dimension_numbers = #tpu.dot_dimension_numbers<[1], [1], [0], [0], [0, 0, 1, 0], [], []>} : vector<32x16xf32>, vector<128x16xf32>, vector<32x128xf32> -> vector<32x128xf32>
    %c0_3 = arith.constant 0 : index
    %c0_4 = arith.constant 0 : index
    %3 = vector.load %arg3[%c0_3, %c0_4] : memref<32x1xf32, #tpu.memory_space<vmem>>, vector<32x1xf32>
    %4 = vector.broadcast %3 : vector<32x1xf32> to vector<32x128xf32>
    %5 = arith.addf %2, %4 : vector<32x128xf32>
    %cst_5 = arith.constant 0.000000e+00 : f32
    %6 = vector.broadcast %cst_5 : f32 to vector<32x128xf32>
    %7 = arith.maximumf %5, %6 : vector<32x128xf32>
    %c0_6 = arith.constant 0 : index
    %c0_7 = arith.constant 0 : index
    %8 = vector.load %arg4[%c0_6, %c0_7] : memref<32x32xf32, #tpu.memory_space<vmem>>, vector<32x32xf32>
    %cst_8 = arith.constant dense<0.000000e+00> : vector<32x128xf32>
    %9 = tpu.matmul %8, %7, %cst_8 {dimension_numbers = #tpu.dot_dimension_numbers<[1], [0], [0], [1], [0, 0, 1, 1], [], []>} : vector<32x32xf32>, vector<32x128xf32>, vector<32x128xf32> -> vector<32x128xf32>
    %c0_9 = arith.constant 0 : index
    %c0_10 = arith.constant 0 : index
    %10 = vector.load %arg5[%c0_9, %c0_10] : memref<32x1xf32, #tpu.memory_space<vmem>>, vector<32x1xf32>
    %11 = vector.broadcast %10 : vector<32x1xf32> to vector<32x128xf32>
    %12 = arith.addf %9, %11 : vector<32x128xf32>
    %cst_11 = arith.constant 0.000000e+00 : f32
    %13 = vector.broadcast %cst_11 : f32 to vector<32x128xf32>
    %14 = arith.maximumf %12, %13 : vector<32x128xf32>
    %c0_12 = arith.constant 0 : index
    %c0_13 = arith.constant 0 : index
    %15 = vector.load %arg6[%c0_12, %c0_13] : memref<32x32xf32, #tpu.memory_space<vmem>>, vector<32x32xf32>
    %cst_14 = arith.constant dense<0.000000e+00> : vector<32x128xf32>
    %16 = tpu.matmul %15, %14, %cst_14 {dimension_numbers = #tpu.dot_dimension_numbers<[1], [0], [0], [1], [0, 0, 1, 1], [], []>} : vector<32x32xf32>, vector<32x128xf32>, vector<32x128xf32> -> vector<32x128xf32>
    %c0_15 = arith.constant 0 : index
    %c0_16 = arith.constant 0 : index
    %17 = vector.load %arg7[%c0_15, %c0_16] : memref<32x1xf32, #tpu.memory_space<vmem>>, vector<32x1xf32>
    %18 = vector.broadcast %17 : vector<32x1xf32> to vector<32x128xf32>
    %19 = arith.addf %16, %18 : vector<32x128xf32>
    %cst_17 = arith.constant 3.000000e+00 : f32
    %20 = vector.broadcast %cst_17 : f32 to vector<32x128xf32>
    %21 = arith.addf %19, %20 : vector<32x128xf32>
    %cst_18 = arith.constant 0.000000e+00 : f32
    %cst_19 = arith.constant 6.000000e+00 : f32
    %22 = vector.broadcast %cst_18 : f32 to vector<32x128xf32>
    %23 = arith.maximumf %22, %21 : vector<32x128xf32>
    %24 = vector.broadcast %cst_19 : f32 to vector<32x128xf32>
    %25 = arith.minimumf %24, %23 : vector<32x128xf32>
    %26 = arith.mulf %19, %25 : vector<32x128xf32>
    %cst_20 = arith.constant 0.166666672 : f32
    %27 = vector.broadcast %cst_20 : f32 to vector<32x128xf32>
    %28 = arith.mulf %26, %27 : vector<32x128xf32>
    %c0_21 = arith.constant 0 : index
    %c0_22 = arith.constant 0 : index
    %29 = vector.load %arg8[%c0_21, %c0_22] : memref<8x32xf32, #tpu.memory_space<vmem>>, vector<8x32xf32>
    %cst_23 = arith.constant dense<0.000000e+00> : vector<8x128xf32>
    %30 = tpu.matmul %29, %28, %cst_23 {dimension_numbers = #tpu.dot_dimension_numbers<[1], [0], [0], [1], [0, 0, 1, 1], [], []>} : vector<8x32xf32>, vector<32x128xf32>, vector<8x128xf32> -> vector<8x128xf32>
    %c0_24 = arith.constant 0 : index
    %c0_25 = arith.constant 0 : index
    %31 = vector.load %arg9[%c0_24, %c0_25] : memref<8x1xf32, #tpu.memory_space<vmem>>, vector<8x1xf32>
    %32 = vector.broadcast %31 : vector<8x1xf32> to vector<8x128xf32>
    %33 = arith.addf %30, %32 : vector<8x128xf32>
    %34 = math.tanh %33 : vector<8x128xf32>
    %c0_26 = arith.constant 0 : index
    %c0_27 = arith.constant 0 : index
    %35 = vector.load %arg10[%c0_26, %c0_27] : memref<8x128xf32, #tpu.memory_space<vmem>>, vector<8x128xf32>
    tpu.vector_store %arg10[%c0_26, %c0_27], %34 {strides = array<i32>} : memref<8x128xf32, #tpu.memory_space<vmem>>, vector<8x128xf32>,
    return
  }
  func.func @transform_0(%arg0: i32) -> (i32, i32) {
    %c0_i32 = arith.constant 0 : i32
    %c0_i32_0 = arith.constant 0 : i32
    return %arg0, %c0_i32 : i32, i32
  }
  func.func @transform_1(%arg0: i32) -> (i32, i32) {
    %c0_i32 = arith.constant 0 : i32
    %c0_i32_0 = arith.constant 0 : i32
    %c0_i32_1 = arith.constant 0 : i32
    return %c0_i32, %c0_i32_0 : i32, i32
  }
  func.func @transform_2(%arg0: i32) -> (i32, i32) {
    %c0_i32 = arith.constant 0 : i32
    %c0_i32_0 = arith.constant 0 : i32
    %c0_i32_1 = arith.constant 0 : i32
    return %c0_i32, %c0_i32_0 : i32, i32
  }
  func.func @transform_3(%arg0: i32) -> (i32, i32) {
    %c0_i32 = arith.constant 0 : i32
    %c0_i32_0 = arith.constant 0 : i32
    %c0_i32_1 = arith.constant 0 : i32
    return %c0_i32, %c0_i32_0 : i32, i32
  }
  func.func @transform_4(%arg0: i32) -> (i32, i32) {
    %c0_i32 = arith.constant 0 : i32
    %c0_i32_0 = arith.constant 0 : i32
    %c0_i32_1 = arith.constant 0 : i32
    return %c0_i32, %c0_i32_0 : i32, i32
  }
  func.func @transform_5(%arg0: i32) -> (i32, i32) {
    %c0_i32 = arith.constant 0 : i32
    %c0_i32_0 = arith.constant 0 : i32
    %c0_i32_1 = arith.constant 0 : i32
    return %c0_i32, %c0_i32_0 : i32, i32
  }
  func.func @transform_6(%arg0: i32) -> (i32, i32) {
    %c0_i32 = arith.constant 0 : i32
    %c0_i32_0 = arith.constant 0 : i32
    %c0_i32_1 = arith.constant 0 : i32
    return %c0_i32, %c0_i32_0 : i32, i32
  }
  func.func @transform_7(%arg0: i32) -> (i32, i32) {
    %c0_i32 = arith.constant 0 : i32
    %c0_i32_0 = arith.constant 0 : i32
    %c0_i32_1 = arith.constant 0 : i32
    return %c0_i32, %c0_i32_0 : i32, i32
  }
  func.func @transform_8(%arg0: i32) -> (i32, i32) {
    %c0_i32 = arith.constant 0 : i32
    %c0_i32_0 = arith.constant 0 : i32
    %c0_i32_1 = arith.constant 0 : i32
    return %c0_i32, %c0_i32_0 : i32, i32
  }
  func.func @transform_9(%arg0: i32) -> (i32, i32) {
    %c0_i32 = arith.constant 0 : i32
    %c0_i32_0 = arith.constant 0 : i32
    return %c0_i32, %arg0 : i32, i32
  }
}

</mosaic_0001>

<bundles_post_ra>
// kernel: tpu_custom_call.1
= control target key start
LH: loop header
LB: loop body
LE: loop exit
PB: predicated region body
PF: predicated region fallthrough
CT: control target
= control target key end

     0   :  { %vm77_vm0 = vcmask 130048   ;;  %v848_v6 = vmov 0   ;;  %s1092_s0 = inlined_call_operand.vmem [shape: f32[128,16], index: 0, kind: input, shape index: {}]   ;;  %s1093_s1 = inlined_call_operand.vmem [shape: f32[32,16], index: 1, kind: input, shape index: {}]   ;;  %s1094_s2 = inlined_call_operand.vmem [shape: f32[32,1], index: 2, kind: input, shape index: {}]   ;;  %s1095_s3 = inlined_call_operand.vmem [shape: f32[32,32], index: 3, kind: input, shape index: {}]   ;;  %s1096_s4 = inlined_call_operand.vmem [shape: f32[32,1], index: 4, kind: input, shape index: {}]   ;;  %s1097_s5 = inlined_call_operand.vmem [shape: f32[32,32], index: 5, kind: input, shape index: {}]   ;;  %s1098_s6 = inlined_call_operand.vmem [shape: f32[32,1], index: 6, kind: input, shape index: {}]   ;;  %s1099_s7 = inlined_call_operand.vmem [shape: f32[8,32], index: 7, kind: input, shape index: {}]   ;;  %s1100_s8 = inlined_call_operand.vmem [shape: f32[8,1], index: 8, kind: input, shape index: {}]   ;;  %s1101_s9 = inlined_call_operand.hbm [shape: f32[8,128], index: 9, kind: output, shape index: {}]  }
   0x1   :  { %v33_v0 = vld [vmem:[%s1092_s0] sm:$0xff]  ;;  %v34_v1 = vld [vmem:[%s1092_s0 + $0x8] sm:$0xff]  ;;  %v35_v2 = vld [vmem:[%s1092_s0 + $0x10] sm:$0xff]  ;;  %820 = vset.pattern.permute.xlu0 %v848_v6  ;;  %821 = vset.pattern.permute.xlu1 %v848_v6 }
   0x2   :  { %v745_v3 = vpack.c.bf16 %v34_v1, %v33_v0  ;;  %vm914_vm1 = vmpackc.low %vm77_vm0, %vm77_vm0  ;;  %v36_v5 = vld [vmem:[%s1092_s0 + $0x18] sm:$0xff]  ;;  %v49_v8 = vld [vmem:[%s1093_s1] sm:$0xff] }
   0x3   :  { %v751_v7 = vpack.c.bf16 %v36_v5, %v35_v2  ;;  %v37_v9 = vld [vmem:[%s1092_s0 + $0x20] sm:$0xff]  ;;  %v38_v10 = vld [vmem:[%s1092_s0 + $0x28] sm:$0xff]  ;;  %700 = vmatprep.mubr.msk.f32.mxu0 %vm77_vm0, %v49_v8  ;;  %v55_v12 = vld [vmem:[%s1094_s2 + $0x10] sm:$0xff] }
   0x4   :  { %747 = vmatprep.subr.msk.bf16.mxu0 %vm914_vm1, %v745_v3  ;;  %v53_v11 = vld [vmem:[%s1094_s2] sm:$0xff]  ;;  %69 = vperm.xlu1 %821, %v55_v12   ;;  %v757_v13 = vpack.c.bf16 %v38_v10, %v37_v9  ;;  %v54_v14 = vld [vmem:[%s1094_s2 + $0x8] sm:$0xff]  ;;  %v56_v15 = vld [vmem:[%s1094_s2 + $0x18] sm:$0xff] }
   0x5   :  { %750 = vmatpush3.bf16.xpose.msk.msra.mxu0 %vm914_vm1, %v745_v3  ;;  %59 = vperm.xlu0 %820, %v53_v11  }
   0x6   :  { %753 = vmatprep.subr.msk.bf16.mxu0 %vm914_vm1, %v751_v7 }
   0x7   :  { %14 = vsyncpa [#allocation3], 0  ;;  %v231_v16 = vld [vmem:[%s1096_s4] sm:$0xff]  ;;  %v39_v17 = vld [vmem:[%s1092_s0 + $0x30] sm:$0xff]  ;;  %vm255_vm2 = vcmask 261120   ;;  %vm850_vm3 = vmmov 0  }
   0x8   :  { %74 = vperm.xlu1 %821, %v56_v15   ;;  %v40_v18 = vld [vmem:[%s1092_s0 + $0x38] sm:$0xff]  ;;  %v232_v19 = vld [vmem:[%s1096_s4 + $0x8] sm:$0xff]  ;;  %v233_v21 = vld [vmem:[%s1096_s4 + $0x10] sm:$0xff]  ;;  %s852_s17 = smov [#allocation2]  }
   0x9   :  { %64 = vperm.xlu0 %820, %v54_v14   ;;  %v763_v20 = vpack.c.bf16 %v40_v18, %v39_v17  ;;  %v234_v22 = vld [vmem:[%s1096_s4 + $0x18] sm:$0xff]  ;;  %v361_v23 = vld [vmem:[%s1098_s6] sm:$0xff]  ;;  %v42_v25 = vld [vmem:[%s1092_s0 + $0x48] sm:$0xff]  ;;  %s590_s18 = sshll.u32 %s852_s17, 4  ;;  %s591_s18 = int_to_ptr.vmem [resolvable:$true] %s590_s18 }
   0xa   :  { %v41_v24 = vld [vmem:[%s1092_s0 + $0x40] sm:$0xff]  ;;  %v362_v26 = vld [vmem:[%s1098_s6 + $0x8] sm:$0xff]  ;;  %v363_v28 = vld [vmem:[%s1098_s6 + $0x10] sm:$0xff]  ;;  %s824_s19 = scalar_lea.vmem %s591_s18, 128  ;;  %p829_p1 = scmp.lt.s32.totalorder %s591_s18, %s591_s18 }
   0xb   :  { %v769_v27 = vpack.c.bf16 %v42_v25, %v41_v24  ;;  %v364_v29 = vld [vmem:[%s1098_s6 + $0x18] sm:$0xff]  ;;  %v503_v30 = vld [vmem:[%s1100_s8] sm:$0xff]  ;;  %v43_v31 = vld [vmem:[%s1092_s0 + $0x50] sm:$0xff]  ;;  %v851_v24 = vmov 0.0   ;;  %p825_p0 = scmp.ne.s32.totalorder %s591_s18, %s824_s19  ;;  %p830_p2 = scmp.lt.s32.totalorder %s824_s19, %s824_s19 }
   0xc   :  { %242 = vperm.xlu1 %821, %v232_v19   ;;  %v44_v32 = vld [vmem:[%s1092_s0 + $0x58] sm:$0xff]  ;;  %v45_v34 = vld [vmem:[%s1092_s0 + $0x60] sm:$0xff]  ;;  %v46_v35 = vld [vmem:[%s1092_s0 + $0x68] sm:$0xff] }
   0xd   :  { %756 = vmatpush3.bf16.xpose.msk.msra.mxu0 %vm914_vm1, %v751_v7  ;;  %237 = vperm.xlu0 %820, %v231_v16   ;;  %v775_v33 = vpack.c.bf16 %v44_v32, %v43_v31  ;;  %v781_v36 = vpack.c.bf16 %v46_v35, %v45_v34  ;;  %v47_v37 = vld [vmem:[%s1092_s0 + $0x70] sm:$0xff]  ;;  %v48_v38 = vld [vmem:[%s1092_s0 + $0x78] sm:$0xff]  ;;  %v50_v40 = vld [vmem:[%s1093_s1 + $0x8] sm:$0xff]  ;;  %p831_p3 = por %p830_p2, %p829_p1 }
   0xe   :  { %759 = vmatprep.subr.msk.bf16.mxu0 %vm914_vm1, %v757_v13  ;;  %v787_v39 = vpack.c.bf16 %v48_v38, %v47_v37  ;;  %v51_v41 = vld [vmem:[%s1093_s1 + $0x10] sm:$0xff]  ;;  %v52_v42 = vld [vmem:[%s1093_s1 + $0x18] sm:$0xff]  ;;  %v227_v43 = vld [vmem:[%s1095_s3] sm:$0xff] }
   0xf   :  { %714 = vmatprep.mubr.msk.f32.mxu1 %vm255_vm2, %v227_v43  ;;  %v228_v62 = vld [vmem:[%s1095_s3 + $0x8] sm:$0xff]  ;;  %v229_v63 = vld [vmem:[%s1095_s3 + $0x10] sm:$0xff]  ;;  %v230_v0 = vld [vmem:[%s1095_s3 + $0x18] sm:$0xff]  ;;  %p832_p4 = pnand %p831_p3, %p825_p0 }
  0x10   :  { %252 = vperm.xlu1 %821, %v234_v22   ;;  %v357_v1 = vld [vmem:[%s1097_s5] sm:$0xff]  ;;  %v360_v22 = vld [vmem:[%s1097_s5 + $0x18] sm:$0xff] }
  0x11   :  { %247 = vperm.xlu0 %820, %v233_v21   ;;  %v359_v21 = vld [vmem:[%s1097_s5 + $0x10] sm:$0xff] }
  0x14   :  { %372 = vperm.xlu1 %821, %v362_v26  }
  0x15   :  { %762 = vmatpush3.bf16.xpose.msk.msra.mxu0 %vm914_vm1, %v757_v13  ;;  %367 = vperm.xlu0 %820, %v361_v23   ;;  %v849_v23 = vmov 0.0|0.0  }
  0x16   :  { %765 = vmatprep.subr.msk.bf16.mxu0 %vm914_vm1, %v763_v20 }
  0x18   :  { %382 = vperm.xlu1 %821, %v364_v29  }
  0x19   :  { %377 = vperm.xlu0 %820, %v363_v28  }
  0x1d   :  { %768 = vmatpush3.bf16.xpose.msk.msra.mxu0 %vm914_vm1, %v763_v20  ;;  %506 = vperm.xlu0 %820, %v503_v30   ;;  %v358_v20 = vld [vmem:[%s1097_s5 + $0x8] sm:$0xff] }
  0x1e   :  { %771 = vmatprep.subr.msk.bf16.mxu0 %vm914_vm1, %v769_v27 }
  0x25   :  { %774 = vmatpush3.bf16.xpose.msk.msra.mxu0 %vm914_vm1, %v769_v27 }
  0x26   :  { %777 = vmatprep.subr.msk.bf16.mxu0 %vm914_vm1, %v775_v33 }
  0x2d   :  { %780 = vmatpush3.bf16.xpose.msk.msra.mxu0 %vm914_vm1, %v775_v33 }
  0x2e   :  { %783 = vmatprep.subr.msk.bf16.mxu0 %vm914_vm1, %v781_v36 }
  0x35   :  { %786 = vmatpush3.bf16.xpose.msk.msra.mxu0 %vm914_vm1, %v781_v36 }
  0x36   :  { %789 = vmatprep.subr.msk.bf16.mxu0 %vm914_vm1, %v787_v39 }
  0x3d   :  { %792 = vmatpush3.bf16.xpose.msk.msra.mxu0 %vm914_vm1, %v787_v39 }
  0x44   :  { %701 = vmatmul.mubr.msk.f32.vlgmr.msra.gmra.mrb[0].mxu0 %vm77_vm0, %v50_v40 }
  0x45   :  { %703 = vmatprep.mubr.msk.f32.mxu0 %vm77_vm0, %v51_v41 }
  0x48   :  { %704 = vmatmul.mubr.msk.f32.gmra.mrb[2].mxu0 %vm77_vm0, %v52_v42 }
  0x83   :  { %v70_v45 = vpop.permute.xlu1 %69 }
  0x84   :  { %v60_v44 = vpop.permute.xlu0 %59 }
  0x87   :  { %v75_v52 = vpop.permute.xlu1 %74 }
  0x88   :  { %v65_v46 = vpop.permute.xlu0 %64 }
  0x8b   :  { %v243_v2 = vpop.permute.xlu1 %242 }
  0x8c   :  { %v238_v3 = vpop.permute.xlu0 %237 }
  0x8f   :  { %v253_v9 = vpop.permute.xlu1 %252 }
  0x90   :  { %v248_v12 = vpop.permute.xlu0 %247 }
  0x93   :  { %v373_v25 = vpop.permute.xlu1 %372 }
  0x94   :  { %v368_v26 = vpop.permute.xlu0 %367 }
  0x97   :  { %v383_v32 = vpop.permute.xlu1 %382 }
  0x98   :  { %v378_v35 = vpop.permute.xlu0 %377 }
 0x117   :  { %v702_v47 = vpop.f32.mrb[0].mxu0 }
 0x118   :  { %v210_v48 = vadd.f32 %v702_v47, %v65_v46  ;;  %v204_v49 = vpop.f32.mrb[1].mxu0 }
 0x119   :  { %v205_v50 = vadd.f32 %v204_v49, %v60_v44 }
 0x11a   :  { %v224_v51 = vmax.f32 %v210_v48, 0.0 }
 0x11b   :  { %v223_v53 = vmax.f32 %v205_v50, 0.0  ;;  %v705_v54 = vpop.f32.mrb[2].mxu0 }
 0x11c   :  { %v220_v55 = vadd.f32 %v705_v54, %v75_v52  ;;  %v214_v56 = vpop.f32.mrb[3].mxu0 }
 0x11d   :  { %v215_v57 = vadd.f32 %v214_v56, %v70_v45  ;;  %v793_v58 = vpack.c.bf16 %v224_v51, %v223_v53 }
 0x11e   :  { %v226_v59 = vmax.f32 %v220_v55, 0.0 }
 0x11f   :  { %v225_v60 = vmax.f32 %v215_v57, 0.0  ;;  %794 = vmatprep.subr.bf16.mxu1 %v793_v58 }
 0x120   :  { %796 = vmatpush3.bf16.msra.mxu1 %v793_v58 }
 0x121   :  { %v797_v61 = vpack.c.bf16 %v226_v59, %v225_v60  ;;  %v502_v59 = vld [vmem:[%s1099_s7] sm:$0xff]  ;;  %v507_v60 = vpop.permute.xlu0 %506 }
 0x123   :  { %798 = vmatprep.subr.bf16.mxu1 %v797_v61 }
 0x124   :  { %800 = vmatpush3.bf16.msra.mxu1 %v797_v61 }
 0x127   :  { %715 = vmatmul.mubr.msk.f32.vlgmr.msra.gmra.mrb[0].mxu1 %vm255_vm2, %v228_v62 }
 0x128   :  { %717 = vmatprep.mubr.msk.f32.mxu1 %vm255_vm2, %v229_v63 }
 0x12b   :  { %718 = vmatmul.mubr.msk.f32.gmra.mrb[2].mxu1 %vm255_vm2, %v230_v0 }
 0x12c   :  { %728 = vmatprep.mubr.msk.f32.mxu1 %vm255_vm2, %v357_v1 }
 0x1fa   :  { %v716_v4 = vpop.f32.mrb[0].mxu1 }
 0x1fb   :  { %v340_v5 = vadd.f32 %v716_v4, %v243_v2  ;;  %v334_v6 = vpop.f32.mrb[1].mxu1 }
 0x1fc   :  { %v335_v7 = vadd.f32 %v334_v6, %v238_v3 }
 0x1fd   :  { %v354_v8 = vmax.f32 %v340_v5, 0.0 }
 0x1fe   :  { %v353_v10 = vmax.f32 %v335_v7, 0.0  ;;  %v719_v11 = vpop.f32.mrb[2].mxu1 }
 0x1ff   :  { %v350_v13 = vadd.f32 %v719_v11, %v253_v9  ;;  %v344_v14 = vpop.f32.mrb[3].mxu1 }
 0x200   :  { %v801_v15 = vpack.c.bf16 %v354_v8, %v353_v10  ;;  %v345_v16 = vadd.f32 %v344_v14, %v248_v12 }
 0x201   :  { %v356_v17 = vmax.f32 %v350_v13, 0.0 }
 0x202   :  { %v355_v18 = vmax.f32 %v345_v16, 0.0  ;;  %802 = vmatprep.subr.bf16.mxu1 %v801_v15 }
 0x203   :  { %804 = vmatpush3.bf16.msra.mxu1 %v801_v15 }
 0x204   :  { %v805_v19 = vpack.c.bf16 %v356_v17, %v355_v18 }
 0x206   :  { %806 = vmatprep.subr.bf16.mxu1 %v805_v19 }
 0x207   :  { %808 = vmatpush3.bf16.msra.mxu1 %v805_v19 }
 0x208   :  { %809 = vmatprep.subr.bf16.mxu1 %v849_v23 }
 0x20a   :  { %729 = vmatmul.mubr.msk.f32.vlgmr.msra.gmra.mrb[4].mxu1 %vm255_vm2, %v358_v20 }
 0x20b   :  { %731 = vmatprep.mubr.msk.f32.mxu1 %vm255_vm2, %v359_v21 }
 0x20e   :  { %732 = vmatmul.mubr.msk.f32.gmra.mrb[6].mxu1 %vm255_vm2, %v360_v22 }
 0x20f   :  { %742 = vmatprep.mubr.msk.f32.mxu1 %vm850_vm3, %v851_v24 }
 0x2dd   :  { %v730_v27 = vpop.f32.mrb[4].mxu1 }
 0x2de   :  { %v469_v28 = vadd.f32 %v730_v27, %v373_v25  ;;  %v463_v29 = vpop.f32.mrb[5].mxu1 }
 0x2df   :  { %v464_v30 = vadd.f32 %v463_v29, %v368_v26 }
 0x2e0   :  { %v483_v31 = vadd.f32 3.0, %v469_v28 }
 0x2e1   :  { %v482_v33 = vadd.f32 3.0, %v464_v30  ;;  %v733_v34 = vpop.f32.mrb[6].mxu1 }
 0x2e2   :  { %v487_v36 = vmax.f32 %v483_v31, 0.0  ;;  %v479_v37 = vadd.f32 %v733_v34, %v383_v32  ;;  %v473_v38 = vpop.f32.mrb[7].mxu1 }
 0x2e3   :  { %v486_v39 = vmax.f32 %v482_v33, 0.0  ;;  %v474_v40 = vadd.f32 %v473_v38, %v378_v35 }
 0x2e4   :  { %v491_v41 = vmin.f32 %v487_v36, 6.0  ;;  %v485_v42 = vadd.f32 3.0, %v479_v37 }
 0x2e5   :  { %v490_v43 = vmin.f32 %v486_v39, 6.0  ;;  %v484_v44 = vadd.f32 3.0, %v474_v40 }
 0x2e6   :  { %v495_v45 = vmul.f32 %v491_v41, %v469_v28  ;;  %v489_v46 = vmax.f32 %v485_v42, 0.0 }
 0x2e7   :  { %v494_v47 = vmul.f32 %v490_v43, %v464_v30  ;;  %v488_v48 = vmax.f32 %v484_v44, 0.0 }
 0x2e8   :  { %v499_v49 = vmul.f32 0.16666667, %v495_v45  ;;  %v493_v50 = vmin.f32 %v489_v46, 6.0 }
 0x2e9   :  { %v498_v51 = vmul.f32 0.16666667, %v494_v47  ;;  %v492_v52 = vmin.f32 %v488_v48, 6.0 }
 0x2ea   :  { %v497_v53 = vmul.f32 %v493_v50, %v479_v37 }
 0x2eb   :  { %v810_v54 = vpack.c.bf16 %v499_v49, %v498_v51  ;;  %v496_v55 = vmul.f32 %v492_v52, %v474_v40 }
 0x2ec   :  { %v501_v56 = vmul.f32 0.16666667, %v497_v53 }
 0x2ed   :  { %v500_v57 = vmul.f32 0.16666667, %v496_v55  ;;  %811 = vmatpush3.bf16.msra.mxu1 %v810_v54 }
 0x2ee   :  { %812 = vmatprep.subr.bf16.mxu1 %v849_v23 }
 0x2ef   :  { %v813_v58 = vpack.c.bf16 %v501_v56, %v500_v57 }
 0x2f1   :  { %814 = vmatpush3.bf16.msra.mxu1 %v813_v58 }
 0x2f4   :  { %743 = vmatmul.mubr.msk.f32.vlgmr.msra.gmra.mrb[8].mxu1 %vm255_vm2, %v502_v59 }
 0x3c7   :  { %v578_v61 = vpop.f32.mrb[8].mxu1 }
 0x3c8   :  { %v579_v62 = vadd.f32 %v578_v61, %v507_v60  ;;  %v744_v63 = vpop.f32.mrb[9].mxu1 }
 0x3ca   :  { %822 = vtanh.f32 %v579_v62 }
 0x3d4   :  { %v823_v0 = vpop.eup %822 }
 0x3d5   :  { %583 = vst [vmem:[#allocation2] sm:$0xff] %v823_v0 }
 0x3d6   :  { %835 = shalt.err (!%p832_p4)
}
 0x3d7   :  { %s836_s21 = scalar_lea.hbm %s1101_s9, 128 }
 0x3d8   :  { %p837_p5 = scmp.ne.s32.totalorder %s1101_s9, %s836_s21  ;;  %p840_p6 = scmp.lt.u32.totalorder %s836_s21, %s1101_s9 }
 0x3da   :  { %p842_p7 = pnand %p840_p6, %p837_p5 }
 0x3dc   :  { %845 = shalt.err (!%p842_p7)
}
 0x3dd   :  { %593 = dma.vmem_to_hbm [thread:$0]  %s591_s18, 128, %s1101_s9, [#allocation3]  }
 0x3de   :  { %846 = dma.done.wait [#allocation3], 128  }
 0x3df   :  { %847 = vsyncadd [#allocation3], 4294967168 }
 0x3e0   :  { %597 = vsyncpa [#allocation3], 1 }

// kernel: tpu_custom_call.1
= control target key start
LH: loop header
LB: loop body
LE: loop exit
PB: predicated region body
PF: predicated region fallthrough
CT: control target
= control target key end

     0   :  { %vm77_vm0 = vcmask 130048   ;;  %v848_v6 = vmov 0   ;;  %s1092_s0 = inlined_call_operand.vmem [shape: f32[128,16], index: 0, kind: input, shape index: {}]   ;;  %s1093_s1 = inlined_call_operand.vmem [shape: f32[32,16], index: 1, kind: input, shape index: {}]   ;;  %s1094_s2 = inlined_call_operand.vmem [shape: f32[32,1], index: 2, kind: input, shape index: {}]   ;;  %s1095_s3 = inlined_call_operand.vmem [shape: f32[32,32], index: 3, kind: input, shape index: {}]   ;;  %s1096_s4 = inlined_call_operand.vmem [shape: f32[32,1], index: 4, kind: input, shape index: {}]   ;;  %s1097_s5 = inlined_call_operand.vmem [shape: f32[32,32], index: 5, kind: input, shape index: {}]   ;;  %s1098_s6 = inlined_call_operand.vmem [shape: f32[32,1], index: 6, kind: input, shape index: {}]   ;;  %s1099_s7 = inlined_call_operand.vmem [shape: f32[8,32], index: 7, kind: input, shape index: {}]   ;;  %s1100_s8 = inlined_call_operand.vmem [shape: f32[8,1], index: 8, kind: input, shape index: {}]   ;;  %s1101_s9 = inlined_call_operand.hbm [shape: f32[8,128], index: 9, kind: output, shape index: {}]  }
   0x1   :  { %v33_v0 = vld [vmem:[%s1092_s0] sm:$0xff]  ;;  %v34_v1 = vld [vmem:[%s1092_s0 + $0x8] sm:$0xff]  ;;  %v35_v2 = vld [vmem:[%s1092_s0 + $0x10] sm:$0xff]  ;;  %820 = vset.pattern.permute.xlu0 %v848_v6  ;;  %821 = vset.pattern.permute.xlu1 %v848_v6 }
   0x2   :  { %v745_v3 = vpack.c.bf16 %v34_v1, %v33_v0  ;;  %vm914_vm1 = vmpackc.low %vm77_vm0, %vm77_vm0  ;;  %v36_v5 = vld [vmem:[%s1092_s0 + $0x18] sm:$0xff]  ;;  %v49_v8 = vld [vmem:[%s1093_s1] sm:$0xff] }
   0x3   :  { %v751_v7 = vpack.c.bf16 %v36_v5, %v35_v2  ;;  %v37_v9 = vld [vmem:[%s1092_s0 + $0x20] sm:$0xff]  ;;  %v38_v10 = vld [vmem:[%s1092_s0 + $0x28] sm:$0xff]  ;;  %700 = vmatprep.mubr.msk.f32.mxu0 %vm77_vm0, %v49_v8  ;;  %v55_v12 = vld [vmem:[%s1094_s2 + $0x10] sm:$0xff] }
   0x4   :  { %747 = vmatprep.subr.msk.bf16.mxu0 %vm914_vm1, %v745_v3  ;;  %v53_v11 = vld [vmem:[%s1094_s2] sm:$0xff]  ;;  %69 = vperm.xlu1 %821, %v55_v12   ;;  %v757_v13 = vpack.c.bf16 %v38_v10, %v37_v9  ;;  %v54_v14 = vld [vmem:[%s1094_s2 + $0x8] sm:$0xff]  ;;  %v56_v15 = vld [vmem:[%s1094_s2 + $0x18] sm:$0xff] }
   0x5   :  { %750 = vmatpush3.bf16.xpose.msk.msra.mxu0 %vm914_vm1, %v745_v3  ;;  %59 = vperm.xlu0 %820, %v53_v11  }
   0x6   :  { %753 = vmatprep.subr.msk.bf16.mxu0 %vm914_vm1, %v751_v7 }
   0x7   :  { %14 = vsyncpa [#allocation3], 0  ;;  %v231_v16 = vld [vmem:[%s1096_s4] sm:$0xff]  ;;  %v39_v17 = vld [vmem:[%s1092_s0 + $0x30] sm:$0xff]  ;;  %vm255_vm2 = vcmask 261120   ;;  %vm850_vm3 = vmmov 0  }
   0x8   :  { %74 = vperm.xlu1 %821, %v56_v15   ;;  %v40_v18 = vld [vmem:[%s1092_s0 + $0x38] sm:$0xff]  ;;  %v232_v19 = vld [vmem:[%s1096_s4 + $0x8] sm:$0xff]  ;;  %v233_v21 = vld [vmem:[%s1096_s4 + $0x10] sm:$0xff]  ;;  %s852_s17 = smov [#allocation2]  }
   0x9   :  { %64 = vperm.xlu0 %820, %v54_v14   ;;  %v763_v20 = vpack.c.bf16 %v40_v18, %v39_v17  ;;  %v234_v22 = vld [vmem:[%s1096_s4 + $0x18] sm:$0xff]  ;;  %v361_v23 = vld [vmem:[%s1098_s6] sm:$0xff]  ;;  %v42_v25 = vld [vmem:[%s1092_s0 + $0x48] sm:$0xff]  ;;  %s590_s18 = sshll.u32 %s852_s17, 4  ;;  %s591_s18 = int_to_ptr.vmem [resolvable:$true] %s590_s18 }
   0xa   :  { %v41_v24 = vld [vmem:[%s1092_s0 + $0x40] sm:$0xff]  ;;  %v362_v26 = vld [vmem:[%s1098_s6 + $0x8] sm:$0xff]  ;;  %v363_v28 = vld [vmem:[%s1098_s6 + $0x10] sm:$0xff]  ;;  %s824_s19 = scalar_lea.vmem %s591_s18, 128  ;;  %p829_p1 = scmp.lt.s32.totalorder %s591_s18, %s591_s18 }
   0xb   :  { %v769_v27 = vpack.c.bf16 %v42_v25, %v41_v24  ;;  %v364_v29 = vld [vmem:[%s1098_s6 + $0x18] sm:$0xff]  ;;  %v503_v30 = vld [vmem:[%s1100_s8] sm:$0xff]  ;;  %v43_v31 = vld [vmem:[%s1092_s0 + $0x50] sm:$0xff]  ;;  %v851_v24 = vmov 0.0   ;;  %p825_p0 = scmp.ne.s32.totalorder %s591_s18, %s824_s19  ;;  %p830_p2 = scmp.lt.s32.totalorder %s824_s19, %s824_s19 }
   0xc   :  { %242 = vperm.xlu1 %821, %v232_v19   ;;  %v44_v32 = vld [vmem:[%s1092_s0 + $0x58] sm:$0xff]  ;;  %v45_v34 = vld [vmem:[%s1092_s0 + $0x60] sm:$0xff]  ;;  %v46_v35 = vld [vmem:[%s1092_s0 + $0x68] sm:$0xff] }
   0xd   :  { %756 = vmatpush3.bf16.xpose.msk.msra.mxu0 %vm914_vm1, %v751_v7  ;;  %237 = vperm.xlu0 %820, %v231_v16   ;;  %v775_v33 = vpack.c.bf16 %v44_v32, %v43_v31  ;;  %v781_v36 = vpack.c.bf16 %v46_v35, %v45_v34  ;;  %v47_v37 = vld [vmem:[%s1092_s0 + $0x70] sm:$0xff]  ;;  %v48_v38 = vld [vmem:[%s1092_s0 + $0x78] sm:$0xff]  ;;  %v50_v40 = vld [vmem:[%s1093_s1 + $0x8] sm:$0xff]  ;;  %p831_p3 = por %p830_p2, %p829_p1 }
   0xe   :  { %759 = vmatprep.subr.msk.bf16.mxu0 %vm914_vm1, %v757_v13  ;;  %v787_v39 = vpack.c.bf16 %v48_v38, %v47_v37  ;;  %v51_v41 = vld [vmem:[%s1093_s1 + $0x10] sm:$0xff]  ;;  %v52_v42 = vld [vmem:[%s1093_s1 + $0x18] sm:$0xff]  ;;  %v227_v43 = vld [vmem:[%s1095_s3] sm:$0xff] }
   0xf   :  { %714 = vmatprep.mubr.msk.f32.mxu1 %vm255_vm2, %v227_v43  ;;  %v228_v62 = vld [vmem:[%s1095_s3 + $0x8] sm:$0xff]  ;;  %v229_v63 = vld [vmem:[%s1095_s3 + $0x10] sm:$0xff]  ;;  %v230_v0 = vld [vmem:[%s1095_s3 + $0x18] sm:$0xff]  ;;  %p832_p4 = pnand %p831_p3, %p825_p0 }
  0x10   :  { %252 = vperm.xlu1 %821, %v234_v22   ;;  %v357_v1 = vld [vmem:[%s1097_s5] sm:$0xff]  ;;  %v360_v22 = vld [vmem:[%s1097_s5 + $0x18] sm:$0xff] }
  0x11   :  { %247 = vperm.xlu0 %820, %v233_v21   ;;  %v359_v21 = vld [vmem:[%s1097_s5 + $0x10] sm:$0xff] }
  0x14   :  { %372 = vperm.xlu1 %821, %v362_v26  }
  0x15   :  { %762 = vmatpush3.bf16.xpose.msk.msra.mxu0 %vm914_vm1, %v757_v13  ;;  %367 = vperm.xlu0 %820, %v361_v23   ;;  %v849_v23 = vmov 0.0|0.0  }
  0x16   :  { %765 = vmatprep.subr.msk.bf16.mxu0 %vm914_vm1, %v763_v20 }
  0x18   :  { %382 = vperm.xlu1 %821, %v364_v29  }
  0x19   :  { %377 = vperm.xlu0 %820, %v363_v28  }
  0x1d   :  { %768 = vmatpush3.bf16.xpose.msk.msra.mxu0 %vm914_vm1, %v763_v20  ;;  %506 = vperm.xlu0 %820, %v503_v30   ;;  %v358_v20 = vld [vmem:[%s1097_s5 + $0x8] sm:$0xff] }
  0x1e   :  { %771 = vmatprep.subr.msk.bf16.mxu0 %vm914_vm1, %v769_v27 }
  0x25   :  { %774 = vmatpush3.bf16.xpose.msk.msra.mxu0 %vm914_vm1, %v769_v27 }
  0x26   :  { %777 = vmatprep.subr.msk.bf16.mxu0 %vm914_vm1, %v775_v33 }
  0x2d   :  { %780 = vmatpush3.bf16.xpose.msk.msra.mxu0 %vm914_vm1, %v775_v33 }
  0x2e   :  { %783 = vmatprep.subr.msk.bf16.mxu0 %vm914_vm1, %v781_v36 }
  0x35   :  { %786 = vmatpush3.bf16.xpose.msk.msra.mxu0 %vm914_vm1, %v781_v36 }
  0x36   :  { %789 = vmatprep.subr.msk.bf16.mxu0 %vm914_vm1, %v787_v39 }
  0x3d   :  { %792 = vmatpush3.bf16.xpose.msk.msra.mxu0 %vm914_vm1, %v787_v39 }
  0x44   :  { %701 = vmatmul.mubr.msk.f32.vlgmr.msra.gmra.mrb[0].mxu0 %vm77_vm0, %v50_v40 }
  0x45   :  { %703 = vmatprep.mubr.msk.f32.mxu0 %vm77_vm0, %v51_v41 }
  0x48   :  { %704 = vmatmul.mubr.msk.f32.gmra.mrb[2].mxu0 %vm77_vm0, %v52_v42 }
  0x83   :  { %v70_v45 = vpop.permute.xlu1 %69 }
  0x84   :  { %v60_v44 = vpop.permute.xlu0 %59 }
  0x87   :  { %v75_v52 = vpop.permute.xlu1 %74 }
  0x88   :  { %v65_v46 = vpop.permute.xlu0 %64 }
  0x8b   :  { %v243_v2 = vpop.permute.xlu1 %242 }
  0x8c   :  { %v238_v3 = vpop.permute.xlu0 %237 }
  0x8f   :  { %v253_v9 = vpop.permute.xlu1 %252 }
  0x90   :  { %v248_v12 = vpop.permute.xlu0 %247 }
  0x93   :  { %v373_v25 = vpop.permute.xlu1 %372 }
  0x94   :  { %v368_v26 = vpop.permute.xlu0 %367 }
  0x97   :  { %v383_v32 = vpop.permute.xlu1 %382 }
  0x98   :  { %v378_v35 = vpop.permute.xlu0 %377 }
 0x117   :  { %v702_v47 = vpop.f32.mrb[0].mxu0 }
 0x118   :  { %v210_v48 = vadd.f32 %v702_v47, %v65_v46  ;;  %v204_v49 = vpop.f32.mrb[1].mxu0 }
 0x119   :  { %v205_v50 = vadd.f32 %v204_v49, %v60_v44 }
 0x11a   :  { %v224_v51 = vmax.f32 %v210_v48, 0.0 }
 0x11b   :  { %v223_v53 = vmax.f32 %v205_v50, 0.0  ;;  %v705_v54 = vpop.f32.mrb[2].mxu0 }
 0x11c   :  { %v220_v55 = vadd.f32 %v705_v54, %v75_v52  ;;  %v214_v56 = vpop.f32.mrb[3].mxu0 }
 0x11d   :  { %v215_v57 = vadd.f32 %v214_v56, %v70_v45  ;;  %v793_v58 = vpack.c.bf16 %v224_v51, %v223_v53 }
 0x11e   :  { %v226_v59 = vmax.f32 %v220_v55, 0.0 }
 0x11f   :  { %v225_v60 = vmax.f32 %v215_v57, 0.0  ;;  %794 = vmatprep.subr.bf16.mxu1 %v793_v58 }
 0x120   :  { %796 = vmatpush3.bf16.msra.mxu1 %v793_v58 }
 0x121   :  { %v797_v61 = vpack.c.bf16 %v226_v59, %v225_v60  ;;  %v502_v59 = vld [vmem:[%s1099_s7] sm:$0xff]  ;;  %v507_v60 = vpop.permute.xlu0 %506 }
 0x123   :  { %798 = vmatprep.subr.bf16.mxu1 %v797_v61 }
 0x124   :  { %800 = vmatpush3.bf16.msra.mxu1 %v797_v61 }
 0x127   :  { %715 = vmatmul.mubr.msk.f32.vlgmr.msra.gmra.mrb[0].mxu1 %vm255_vm2, %v228_v62 }
 0x128   :  { %717 = vmatprep.mubr.msk.f32.mxu1 %vm255_vm2, %v229_v63 }
 0x12b   :  { %718 = vmatmul.mubr.msk.f32.gmra.mrb[2].mxu1 %vm255_vm2, %v230_v0 }
 0x12c   :  { %728 = vmatprep.mubr.msk.f32.mxu1 %vm255_vm2, %v357_v1 }
 0x1fa   :  { %v716_v4 = vpop.f32.mrb[0].mxu1 }
 0x1fb   :  { %v340_v5 = vadd.f32 %v716_v4, %v243_v2  ;;  %v334_v6 = vpop.f32.mrb[1].mxu1 }
 0x1fc   :  { %v335_v7 = vadd.f32 %v334_v6, %v238_v3 }
 0x1fd   :  { %v354_v8 = vmax.f32 %v340_v5, 0.0 }
 0x1fe   :  { %v353_v10 = vmax.f32 %v335_v7, 0.0  ;;  %v719_v11 = vpop.f32.mrb[2].mxu1 }
 0x1ff   :  { %v350_v13 = vadd.f32 %v719_v11, %v253_v9  ;;  %v344_v14 = vpop.f32.mrb[3].mxu1 }
 0x200   :  { %v801_v15 = vpack.c.bf16 %v354_v8, %v353_v10  ;;  %v345_v16 = vadd.f32 %v344_v14, %v248_v12 }
 0x201   :  { %v356_v17 = vmax.f32 %v350_v13, 0.0 }
 0x202   :  { %v355_v18 = vmax.f32 %v345_v16, 0.0  ;;  %802 = vmatprep.subr.bf16.mxu1 %v801_v15 }
 0x203   :  { %804 = vmatpush3.bf16.msra.mxu1 %v801_v15 }
 0x204   :  { %v805_v19 = vpack.c.bf16 %v356_v17, %v355_v18 }
 0x206   :  { %806 = vmatprep.subr.bf16.mxu1 %v805_v19 }
 0x207   :  { %808 = vmatpush3.bf16.msra.mxu1 %v805_v19 }
 0x208   :  { %809 = vmatprep.subr.bf16.mxu1 %v849_v23 }
 0x20a   :  { %729 = vmatmul.mubr.msk.f32.vlgmr.msra.gmra.mrb[4].mxu1 %vm255_vm2, %v358_v20 }
 0x20b   :  { %731 = vmatprep.mubr.msk.f32.mxu1 %vm255_vm2, %v359_v21 }
 0x20e   :  { %732 = vmatmul.mubr.msk.f32.gmra.mrb[6].mxu1 %vm255_vm2, %v360_v22 }
 0x20f   :  { %742 = vmatprep.mubr.msk.f32.mxu1 %vm850_vm3, %v851_v24 }
 0x2dd   :  { %v730_v27 = vpop.f32.mrb[4].mxu1 }
 0x2de   :  { %v469_v28 = vadd.f32 %v730_v27, %v373_v25  ;;  %v463_v29 = vpop.f32.mrb[5].mxu1 }
 0x2df   :  { %v464_v30 = vadd.f32 %v463_v29, %v368_v26 }
 0x2e0   :  { %v483_v31 = vadd.f32 3.0, %v469_v28 }
 0x2e1   :  { %v482_v33 = vadd.f32 3.0, %v464_v30  ;;  %v733_v34 = vpop.f32.mrb[6].mxu1 }
 0x2e2   :  { %v487_v36 = vmax.f32 %v483_v31, 0.0  ;;  %v479_v37 = vadd.f32 %v733_v34, %v383_v32  ;;  %v473_v38 = vpop.f32.mrb[7].mxu1 }
 0x2e3   :  { %v486_v39 = vmax.f32 %v482_v33, 0.0  ;;  %v474_v40 = vadd.f32 %v473_v38, %v378_v35 }
 0x2e4   :  { %v491_v41 = vmin.f32 %v487_v36, 6.0  ;;  %v485_v42 = vadd.f32 3.0, %v479_v37 }
 0x2e5   :  { %v490_v43 = vmin.f32 %v486_v39, 6.0  ;;  %v484_v44 = vadd.f32 3.0, %v474_v40 }
 0x2e6   :  { %v495_v45 = vmul.f32 %v491_v41, %v469_v28  ;;  %v489_v46 = vmax.f32 %v485_v42, 0.0 }
 0x2e7   :  { %v494_v47 = vmul.f32 %v490_v43, %v464_v30  ;;  %v488_v48 = vmax.f32 %v484_v44, 0.0 }
 0x2e8   :  { %v499_v49 = vmul.f32 0.16666667, %v495_v45  ;;  %v493_v50 = vmin.f32 %v489_v46, 6.0 }
 0x2e9   :  { %v498_v51 = vmul.f32 0.16666667, %v494_v47  ;;  %v492_v52 = vmin.f32 %v488_v48, 6.0 }
 0x2ea   :  { %v497_v53 = vmul.f32 %v493_v50, %v479_v37 }
 0x2eb   :  { %v810_v54 = vpack.c.bf16 %v499_v49, %v498_v51  ;;  %v496_v55 = vmul.f32 %v492_v52, %v474_v40 }
 0x2ec   :  { %v501_v56 = vmul.f32 0.16666667, %v497_v53 }
 0x2ed   :  { %v500_v57 = vmul.f32 0.16666667, %v496_v55  ;;  %811 = vmatpush3.bf16.msra.mxu1 %v810_v54 }
 0x2ee   :  { %812 = vmatprep.subr.bf16.mxu1 %v849_v23 }
 0x2ef   :  { %v813_v58 = vpack.c.bf16 %v501_v56, %v500_v57 }
 0x2f1   :  { %814 = vmatpush3.bf16.msra.mxu1 %v813_v58 }
 0x2f4   :  { %743 = vmatmul.mubr.msk.f32.vlgmr.msra.gmra.mrb[8].mxu1 %vm255_vm2, %v502_v59 }
 0x3c7   :  { %v578_v61 = vpop.f32.mrb[8].mxu1 }
 0x3c8   :  { %v579_v62 = vadd.f32 %v578_v61, %v507_v60  ;;  %v744_v63 = vpop.f32.mrb[9].mxu1 }
 0x3ca   :  { %822 = vtanh.f32 %v579_v62 }
 0x3d4   :  { %v823_v0 = vpop.eup %822 }
 0x3d5   :  { %583 = vst [vmem:[#allocation2] sm:$0xff] %v823_v0 }
 0x3d6   :  { %835 = shalt.err (!%p832_p4)
}
 0x3d7   :  { %s836_s21 = scalar_lea.hbm %s1101_s9, 128 }
 0x3d8   :  { %p837_p5 = scmp.ne.s32.totalorder %s1101_s9, %s836_s21  ;;  %p840_p6 = scmp.lt.u32.totalorder %s836_s21, %s1101_s9 }
 0x3da   :  { %p842_p7 = pnand %p840_p6, %p837_p5 }
 0x3dc   :  { %845 = shalt.err (!%p842_p7)
}
 0x3dd   :  { %593 = dma.vmem_to_hbm [thread:$0]  %s591_s18, 128, %s1101_s9, [#allocation3]  }
 0x3de   :  { %846 = dma.done.wait [#allocation3], 128  }
 0x3df   :  { %847 = vsyncadd [#allocation3], 4294967168 }
 0x3e0   :  { %597 = vsyncpa [#allocation3], 1 }

</bundles_post_ra>
